<compile_context>
chip_gen: v5e
topology: v5e:2x2
jax: 0.10.0
libtpu: 0.0.40
codegen_flags: <defaults>
</compile_context>

<pallas_src>
import jax
import jax.numpy as jnp
from jax.experimental import pallas as pl
from jax.experimental.pallas import tpu as pltpu


# ---------------------------------------------------------------------------
# Fused kernel: prompt assembly + ctx projection + deep-prompt projections.
# Single grid step; all inputs/outputs are whole-array VMEM blocks.
# ---------------------------------------------------------------------------
def _maple_fwd_kernel(prefix_ref, ctx_ref, suffix_ref, deep_x_ref,
                      proj_wt_ref, proj_b_ref, comp_wt_ref, comp_b_ref,
                      prompts_ref, shared_ref, deep_y_ref):
    n_cls = prefix_ref.shape[0]
    n_ctx, d = ctx_ref.shape

    ctx = ctx_ref[...]                                          # (n_ctx, D)

    # --- prompts = cat([prefix, ctx (broadcast over classes), suffix], axis=1) ---
    prompts_ref[:, 0:1, :] = prefix_ref[...]                    # (n_cls, 1, D)
    prompts_ref[:, 1:1 + n_ctx, :] = jnp.broadcast_to(ctx[None], (n_cls, n_ctx, d))
    prompts_ref[:, 1 + n_ctx:, :] = suffix_ref[...]             # (n_cls, n_suf, D)

    # --- shared_ctx = ctx @ W_proj^T + b_proj  (W pre-transposed to (din, dout)) ---
    shared = jnp.dot(ctx, proj_wt_ref[...], preferred_element_type=jnp.float32)
    shared_ref[...] = (shared + proj_b_ref[...]).astype(shared_ref.dtype)

    # --- all deep visual prompts in ONE matmul (clones share one weight) ---
    deep = jnp.dot(deep_x_ref[...], comp_wt_ref[...],
                   preferred_element_type=jnp.float32)
    deep_y_ref[...] = (deep + comp_b_ref[...]).astype(deep_y_ref.dtype)


def maple_forward(prefix, ctx, suffix, deep_x, proj_wt, proj_b, comp_wt, comp_b):
    """Single-step fused forward.

    prefix : (n_cls, 1, D)        ctx     : (n_ctx, D)
    suffix : (n_cls, n_suf, D)    deep_x  : ((depth-1)*n_ctx, D)
    proj_wt: (D, V)  proj_b: (1, V)  comp_wt: (D, V)  comp_b: (1, V)
    returns: prompts (n_cls, 1+n_ctx+n_suf, D), shared_ctx (n_ctx, V),
             deep_y ((depth-1)*n_ctx, V)
    """
    n_cls, _, d = prefix.shape
    n_ctx = ctx.shape[0]
    n_suf = suffix.shape[1]
    seq = 1 + n_ctx + n_suf
    vis = proj_wt.shape[1]
    n_deep_rows = deep_x.shape[0]

    vmem = pl.BlockSpec(memory_space=pltpu.MemorySpace.VMEM)    # whole array in VMEM
    return pl.pallas_call(
        _maple_fwd_kernel,
        out_shape=(
            jax.ShapeDtypeStruct((n_cls, seq, d), ctx.dtype),
            jax.ShapeDtypeStruct((n_ctx, vis), ctx.dtype),
            jax.ShapeDtypeStruct((n_deep_rows, vis), ctx.dtype),
        ),
        in_specs=[vmem] * 8,
        out_specs=(vmem, vmem, vmem),
    )(prefix, ctx, suffix, deep_x, proj_wt, proj_b, comp_wt, comp_b)


# ---------------------------------------------------------------------------
# MultiModalPromptLearner in JAX (parameters built deterministically in-script)
# ---------------------------------------------------------------------------
class MultiModalPromptLearner:
    def __init__(self, key, *, n_cls=4, n_ctx=4, ctx_dim=128, vis_dim=256,
                 seq_len=16, depth=3, dtype=jnp.float32):
        assert 1 <= depth <= 12
        self.n_cls, self.n_ctx, self.depth = n_cls, n_ctx, depth
        n_suffix = seq_len - 1 - n_ctx
        ks = jax.random.split(key, 8)

        # learnable context vectors (std=0.02 normal, like nn.init.normal_)
        self.ctx = 0.02 * jax.random.normal(ks[0], (n_ctx, ctx_dim), dtype)

        # frozen token embeddings for prefix (SOS) / suffix (class tokens + EOS + pad)
        # (synthetic stand-in for clip_model.token_embedding output)
        self.token_prefix = jax.random.normal(ks[1], (n_cls, 1, ctx_dim), dtype)
        self.token_suffix = jax.random.normal(ks[2], (n_cls, n_suffix, ctx_dim), dtype)

        # deep text prompts: (depth-1) params of shape (n_ctx, ctx_dim)
        self.compound_prompts_text = 0.02 * jax.random.normal(
            ks[3], (depth - 1, n_ctx, ctx_dim), dtype)

        # proj: nn.Linear(ctx_dim, vis_dim) (PyTorch default uniform init)
        bound = 1.0 / (ctx_dim ** 0.5)
        self.proj_w = jax.random.uniform(ks[4], (vis_dim, ctx_dim), dtype, -bound, bound)
        self.proj_b = jax.random.uniform(ks[5], (vis_dim,), dtype, -bound, bound)

        # compound_prompt_projections = deep-copies of ONE single_layer
        # -> identical weights, so keep just the single (vis_dim, ctx_dim) weight.
        self.comp_w = jax.random.uniform(ks[6], (vis_dim, ctx_dim), dtype, -bound, bound)
        self.comp_b = jax.random.uniform(ks[7], (vis_dim,), dtype, -bound, bound)

        # One-time kernel-friendly layouts: pre-transposed weights (din, dout) and
        # 2-D biases (1, dout). Pure layout plumbing, done once at init.
        self.proj_wt = self.proj_w.T
        self.comp_wt = self.comp_w.T
        self.proj_b2 = self.proj_b[None, :]
        self.comp_b2 = self.comp_b[None, :]

    def __call__(self):
        depth, n_ctx = self.depth, self.n_ctx
        ctx_dim = self.ctx.shape[-1]

        # Flatten all deep text prompts into one LHS for a single MXU matmul.
        deep_x = self.compound_prompts_text.reshape((depth - 1) * n_ctx, ctx_dim)

        prompts, shared_ctx, deep_y = maple_forward(
            self.token_prefix, self.ctx, self.token_suffix, deep_x,
            self.proj_wt, self.proj_b2, self.comp_wt, self.comp_b2)

        visual_deep = deep_y.reshape(depth - 1, n_ctx, -1)
        visual_deep_prompts = [visual_deep[i] for i in range(depth - 1)]
        compound_prompts_text = [self.compound_prompts_text[i]
                                 for i in range(depth - 1)]
        return prompts, shared_ctx, compound_prompts_text, visual_deep_prompts


if __name__ == "__main__":
    key = jax.random.PRNGKey(0)
    learner = MultiModalPromptLearner(key, n_cls=4, n_ctx=4, ctx_dim=128,
                                      vis_dim=256, seq_len=16, depth=3)

    prompts, shared_ctx, cpt, vdp = learner()
    jax.block_until_ready((prompts, shared_ctx, cpt, vdp))

    # ---- reference check in plain JAX ----
    ctx_exp = jnp.broadcast_to(learner.ctx[None], (learner.n_cls,) + learner.ctx.shape)
    prompts_ref = jnp.concatenate(
        [learner.token_prefix, ctx_exp, learner.token_suffix], axis=1)
    shared_ref = learner.ctx @ learner.proj_w.T + learner.proj_b
    vdp_ref = [learner.compound_prompts_text[i] @ learner.comp_w.T + learner.comp_b
               for i in range(learner.depth - 1)]
    cpt_ref = [learner.compound_prompts_text[i] for i in range(learner.depth - 1)]

    assert prompts.shape == (4, 16, 128)
    assert shared_ctx.shape == (4, 256)
    assert jnp.allclose(prompts, prompts_ref, atol=1e-5)
    assert jnp.allclose(shared_ctx, shared_ref, atol=1e-4)
    for a, b in zip(vdp, vdp_ref):
        assert a.shape == (4, 256)
        assert jnp.allclose(a, b, atol=1e-4)
    for a, b in zip(cpt, cpt_ref):
        assert jnp.allclose(a, b)

    print("KERNEL_OK")
</pallas_src>

<mosaic_0001>
module attributes {stable_mosaic.version = 11 : i64} {
  func.func @_maple_fwd_kernel(%arg0: memref<4x1x128xf32, #tpu.memory_space<vmem>>, %arg1: memref<4x128xf32, #tpu.memory_space<vmem>>, %arg2: memref<4x11x128xf32, #tpu.memory_space<vmem>>, %arg3: memref<8x128xf32, #tpu.memory_space<vmem>>, %arg4: memref<128x256xf32, #tpu.memory_space<vmem>>, %arg5: memref<1x256xf32, #tpu.memory_space<vmem>>, %arg6: memref<128x256xf32, #tpu.memory_space<vmem>>, %arg7: memref<1x256xf32, #tpu.memory_space<vmem>>, %arg8: memref<4x16x128xf32, #tpu.memory_space<vmem>>, %arg9: memref<4x256xf32, #tpu.memory_space<vmem>>, %arg10: memref<8x256xf32, #tpu.memory_space<vmem>>) attributes {dimension_semantics = [], scalar_prefetch = 0 : i64, scratch_operands = 0 : i64, tpu.core_type = #tpu.core_type<tc>} {
    %c0 = arith.constant 0 : index
    %c0_0 = arith.constant 0 : index
    %0 = vector.load %arg1[%c0, %c0_0] : memref<4x128xf32, #tpu.memory_space<vmem>>, vector<4x128xf32>
    %c0_1 = arith.constant 0 : index
    %c0_2 = arith.constant 0 : index
    %c0_3 = arith.constant 0 : index
    %1 = vector.load %arg0[%c0_1, %c0_2, %c0_3] : memref<4x1x128xf32, #tpu.memory_space<vmem>>, vector<4x1x128xf32>
    %c0_4 = arith.constant 0 : index
    %c0_5 = arith.constant 0 : index
    %c0_6 = arith.constant 0 : index
    %2 = vector.load %arg8[%c0_4, %c0_5, %c0_6] : memref<4x16x128xf32, #tpu.memory_space<vmem>>, vector<4x1x128xf32>
    tpu.vector_store %arg8[%c0_4, %c0_5, %c0_6], %1 {strides = array<i32>} : memref<4x16x128xf32, #tpu.memory_space<vmem>>, vector<4x1x128xf32>,
    %3 = vector.shape_cast %0 : vector<4x128xf32> to vector<1x4x128xf32>
    %4 = vector.shape_cast %3 : vector<1x4x128xf32> to vector<1x4x128xf32>
    %5 = vector.broadcast %4 : vector<1x4x128xf32> to vector<4x4x128xf32>
    %c0_7 = arith.constant 0 : index
    %c1 = arith.constant 1 : index
    %c0_8 = arith.constant 0 : index
    %6 = vector.load %arg8[%c0_7, %c1, %c0_8] : memref<4x16x128xf32, #tpu.memory_space<vmem>>, vector<4x4x128xf32>
    tpu.vector_store %arg8[%c0_7, %c1, %c0_8], %5 {strides = array<i32>} : memref<4x16x128xf32, #tpu.memory_space<vmem>>, vector<4x4x128xf32>,
    %c0_9 = arith.constant 0 : index
    %c0_10 = arith.constant 0 : index
    %c0_11 = arith.constant 0 : index
    %7 = vector.load %arg2[%c0_9, %c0_10, %c0_11] : memref<4x11x128xf32, #tpu.memory_space<vmem>>, vector<4x11x128xf32>
    %c0_12 = arith.constant 0 : index
    %c5 = arith.constant 5 : index
    %c0_13 = arith.constant 0 : index
    %8 = vector.load %arg8[%c0_12, %c5, %c0_13] : memref<4x16x128xf32, #tpu.memory_space<vmem>>, vector<4x11x128xf32>
    tpu.vector_store %arg8[%c0_12, %c5, %c0_13], %7 {strides = array<i32>} : memref<4x16x128xf32, #tpu.memory_space<vmem>>, vector<4x11x128xf32>,
    %c0_14 = arith.constant 0 : index
    %c0_15 = arith.constant 0 : index
    %9 = vector.load %arg4[%c0_14, %c0_15] : memref<128x256xf32, #tpu.memory_space<vmem>>, vector<128x256xf32>
    %cst = arith.constant dense<0.000000e+00> : vector<4x256xf32>
    %10 = tpu.matmul %0, %9, %cst {dimension_numbers = #tpu.dot_dimension_numbers<[1], [0], [0], [1], [0, 0, 1, 1], [], []>} : vector<4x128xf32>, vector<128x256xf32>, vector<4x256xf32> -> vector<4x256xf32>
    %c0_16 = arith.constant 0 : index
    %c0_17 = arith.constant 0 : index
    %11 = vector.load %arg5[%c0_16, %c0_17] : memref<1x256xf32, #tpu.memory_space<vmem>>, vector<1x256xf32>
    %12 = vector.broadcast %11 : vector<1x256xf32> to vector<4x256xf32>
    %13 = arith.addf %10, %12 : vector<4x256xf32>
    %c0_18 = arith.constant 0 : index
    %c0_19 = arith.constant 0 : index
    %14 = vector.load %arg9[%c0_18, %c0_19] : memref<4x256xf32, #tpu.memory_space<vmem>>, vector<4x256xf32>
    tpu.vector_store %arg9[%c0_18, %c0_19], %13 {strides = array<i32>} : memref<4x256xf32, #tpu.memory_space<vmem>>, vector<4x256xf32>,
    %c0_20 = arith.constant 0 : index
    %c0_21 = arith.constant 0 : index
    %15 = vector.load %arg3[%c0_20, %c0_21] : memref<8x128xf32, #tpu.memory_space<vmem>>, vector<8x128xf32>
    %c0_22 = arith.constant 0 : index
    %c0_23 = arith.constant 0 : index
    %16 = vector.load %arg6[%c0_22, %c0_23] : memref<128x256xf32, #tpu.memory_space<vmem>>, vector<128x256xf32>
    %cst_24 = arith.constant dense<0.000000e+00> : vector<8x256xf32>
    %17 = tpu.matmul %15, %16, %cst_24 {dimension_numbers = #tpu.dot_dimension_numbers<[1], [0], [0], [1], [0, 0, 1, 1], [], []>} : vector<8x128xf32>, vector<128x256xf32>, vector<8x256xf32> -> vector<8x256xf32>
    %c0_25 = arith.constant 0 : index
    %c0_26 = arith.constant 0 : index
    %18 = vector.load %arg7[%c0_25, %c0_26] : memref<1x256xf32, #tpu.memory_space<vmem>>, vector<1x256xf32>
    %19 = vector.broadcast %18 : vector<1x256xf32> to vector<8x256xf32>
    %20 = arith.addf %17, %19 : vector<8x256xf32>
    %c0_27 = arith.constant 0 : index
    %c0_28 = arith.constant 0 : index
    %21 = vector.load %arg10[%c0_27, %c0_28] : memref<8x256xf32, #tpu.memory_space<vmem>>, vector<8x256xf32>
    tpu.vector_store %arg10[%c0_27, %c0_28], %20 {strides = array<i32>} : memref<8x256xf32, #tpu.memory_space<vmem>>, vector<8x256xf32>,
    return
  }
}

</mosaic_0001>

<bundles_post_ra>
// kernel: tpu_custom_call.1
= control target key start
LH: loop header
LB: loop body
LE: loop exit
PB: predicated region body
PF: predicated region fallthrough
CT: control target
= control target key end

     0   :  { %16 = vsyncpa [#allocation3], 0  ;;  %s576_s0 = inlined_call_operand.vmem [shape: f32[4,1,128], index: 0, kind: input, shape index: {}]   ;;  %s577_s1 = inlined_call_operand.vmem [shape: f32[4,128], index: 1, kind: input, shape index: {}]   ;;  %s578_s2 = inlined_call_operand.vmem [shape: f32[4,11,128], index: 2, kind: input, shape index: {}]   ;;  %s579_s3 = inlined_call_operand.vmem [shape: f32[8,128], index: 3, kind: input, shape index: {}]   ;;  %s580_s4 = inlined_call_operand.hbm [shape: f32[128,256], index: 4, kind: input, shape index: {}]   ;;  %s581_s5 = inlined_call_operand.vmem [shape: f32[1,256], index: 5, kind: input, shape index: {}]   ;;  %s582_s6 = inlined_call_operand.hbm [shape: f32[128,256], index: 6, kind: input, shape index: {}]   ;;  %s583_s7 = inlined_call_operand.vmem [shape: f32[1,256], index: 7, kind: input, shape index: {}]   ;;  %s584_s8 = inlined_call_operand.hbm [shape: f32[4,16,128], index: 8, kind: output, shape index: {0}]   ;;  %s585_s9 = inlined_call_operand.hbm [shape: f32[4,256], index: 9, kind: output, shape index: {1}]   ;;  %s586_s10 = inlined_call_operand.hbm [shape: f32[8,256], index: 10, kind: output, shape index: {2}]  }
   0x1   :  { %17 = vsyncpa [#allocation6], 0 }
   0x2   :  { %18 = vsyncpa [#allocation4], 0 }
   0x3   :  { %19 = vsyncpa [#allocation9], 0  ;;  %s32_s15 = sshll.u32 %s580_s4, 4  ;;  %s449_s16 = smov [#allocation2]   ;;  %s33_s15 = int_to_ptr.hbm [resolvable:$true] %s32_s15 }
   0x4   :  { %s34_s17 = sshll.u32 %s449_s16, 4  ;;  %s47_s20 = sshll.u32 %s582_s6, 4  ;;  %s35_s17 = int_to_ptr.vmem [resolvable:$true] %s34_s17  ;;  %s48_s20 = int_to_ptr.hbm [resolvable:$true] %s47_s20 }
   0x5   :  { %s450_s21 = smov 256   ;;  %s451_s22 = smov 16  }
   0x6   :  { %40 = dma.hbm_to_vmem [thread:$0]  %s33_s15, 4096, %s35_s17, [#allocation3], %s450_s21, %s450_s21, %s451_s22  }
   0x7   :  { %s452_s23 = smov [#allocation5]  }
   0x8   :  { %s49_s24 = sshll.u32 %s452_s23, 4  ;;  %s50_s24 = int_to_ptr.vmem [resolvable:$true] %s49_s24 }
   0x9   :  { %55 = dma.hbm_to_vmem [thread:$0]  %s48_s20, 4096, %s50_s24, [#allocation6], %s450_s21, %s450_s21, %s451_s22  }
   0xa   :  { %441 = dma.done.wait [#allocation3], 4096  }
   0xb   :  { %442 = vsyncadd [#allocation3], 4294963200 }
   0xc   :  { %443 = dma.done.wait [#allocation6], 4096  }
   0xd   :  { %444 = vsyncadd [#allocation6], 4294963200  ;;  %v211_v0 = vld [vmem:[#allocation5 + $0xf0] sm:$0xff]  ;;  %v212_v1 = vld [vmem:[#allocation5 + $0xf8] sm:$0xff]  ;;  %s453_s22 = smov [#allocation7]   ;;  %s267_s6 = sshll.u32 %s584_s8, 4  ;;  %s268_s6 = int_to_ptr.hbm [resolvable:$true] %s267_s6 }
   0xe   :  { %v126_v2 = vld [vmem:[#allocation2 + $0xf8] sm:$0xff]  ;;  %219 = vmatpush.msra.mxu2 %v211_v0  ;;  %239 = vmatpush.msra.mxu3 %v212_v1  ;;  %v209_v3 = vld [vmem:[#allocation5 + $0xe0] sm:$0xff]  ;;  %v210_v4 = vld [vmem:[#allocation5 + $0xe8] sm:$0xff]  ;;  %s265_s23 = sshll.u32 %s453_s22, 4  ;;  %s454_s8 = smov 128   ;;  %vm176_vm0 = vcmask 1043456   ;;  %s266_s23 = int_to_ptr.vmem [resolvable:$true] %s265_s23 }
   0xf   :  { %v125_v5 = vld [vmem:[#allocation2 + $0xf0] sm:$0xff]  ;;  %153 = vmatpush.msra.mxu1 %v126_v2  ;;  %v124_v6 = vld [vmem:[#allocation2 + $0xe8] sm:$0xff]  ;;  %v208_v8 = vld [vmem:[#allocation5 + $0xd8] sm:$0xff]  ;;  %s281_s17 = sshll.u32 %s585_s9, 4  ;;  %s282_s17 = int_to_ptr.hbm [resolvable:$true] %s281_s17 }
  0x10   :  { %133 = vmatpush.msra.mxu0 %v125_v5  ;;  %v207_v7 = vld [vmem:[#allocation5 + $0xd0] sm:$0xff]  ;;  %220 = vmatpush.msra.mxu2 %v209_v3  ;;  %v123_v9 = vld [vmem:[#allocation2 + $0xe0] sm:$0xff]  ;;  %v122_v10 = vld [vmem:[#allocation2 + $0xd8] sm:$0xff] }
  0x11   :  { %240 = vmatpush.msra.mxu3 %v210_v4  ;;  %154 = vmatpush.msra.mxu1 %v124_v6  ;;  %v205_v11 = vld [vmem:[#allocation5 + $0xc0] sm:$0xff]  ;;  %v206_v12 = vld [vmem:[#allocation5 + $0xc8] sm:$0xff]  ;;  %v121_v13 = vld [vmem:[#allocation2 + $0xd0] sm:$0xff] }
  0x12   :  { %134 = vmatpush.msra.mxu0 %v123_v9  ;;  %221 = vmatpush.msra.mxu2 %v207_v7  ;;  %v120_v14 = vld [vmem:[#allocation2 + $0xc8] sm:$0xff]  ;;  %v119_v15 = vld [vmem:[#allocation2 + $0xc0] sm:$0xff]  ;;  %v203_v16 = vld [vmem:[#allocation5 + $0xb0] sm:$0xff] }
  0x13   :  { %241 = vmatpush.msra.mxu3 %v208_v8  ;;  %155 = vmatpush.msra.mxu1 %v122_v10  ;;  %v204_v17 = vld [vmem:[#allocation5 + $0xb8] sm:$0xff]  ;;  %v117_v19 = vld [vmem:[#allocation2 + $0xb0] sm:$0xff]  ;;  %v201_v20 = vld [vmem:[#allocation5 + $0xa0] sm:$0xff] }
  0x14   :  { %135 = vmatpush.msra.mxu0 %v121_v13  ;;  %222 = vmatpush.msra.mxu2 %v205_v11  ;;  %v118_v18 = vld [vmem:[#allocation2 + $0xb8] sm:$0xff]  ;;  %v202_v21 = vld [vmem:[#allocation5 + $0xa8] sm:$0xff]  ;;  %v115_v23 = vld [vmem:[#allocation2 + $0xa0] sm:$0xff] }
  0x15   :  { %242 = vmatpush.msra.mxu3 %v206_v12  ;;  %156 = vmatpush.msra.mxu1 %v120_v14  ;;  %v116_v22 = vld [vmem:[#allocation2 + $0xa8] sm:$0xff]  ;;  %v199_v24 = vld [vmem:[#allocation5 + $0x90] sm:$0xff]  ;;  %v200_v25 = vld [vmem:[#allocation5 + $0x98] sm:$0xff] }
  0x16   :  { %136 = vmatpush.msra.mxu0 %v119_v15  ;;  %223 = vmatpush.msra.mxu2 %v203_v16  ;;  %v114_v26 = vld [vmem:[#allocation2 + $0x98] sm:$0xff]  ;;  %v113_v27 = vld [vmem:[#allocation2 + $0x90] sm:$0xff]  ;;  %v197_v28 = vld [vmem:[#allocation5 + $0x80] sm:$0xff] }
  0x17   :  { %243 = vmatpush.msra.mxu3 %v204_v17  ;;  %157 = vmatpush.msra.mxu1 %v118_v18  ;;  %v198_v29 = vld [vmem:[#allocation5 + $0x88] sm:$0xff]  ;;  %v111_v31 = vld [vmem:[#allocation2 + $0x80] sm:$0xff]  ;;  %v195_v32 = vld [vmem:[#allocation5 + $0x70] sm:$0xff] }
  0x18   :  { %137 = vmatpush.msra.mxu0 %v117_v19  ;;  %224 = vmatpush.msra.mxu2 %v201_v20  ;;  %v112_v30 = vld [vmem:[#allocation2 + $0x88] sm:$0xff]  ;;  %v196_v33 = vld [vmem:[#allocation5 + $0x78] sm:$0xff]  ;;  %v109_v35 = vld [vmem:[#allocation2 + $0x70] sm:$0xff] }
  0x19   :  { %244 = vmatpush.msra.mxu3 %v202_v21  ;;  %158 = vmatpush.msra.mxu1 %v116_v22  ;;  %v110_v34 = vld [vmem:[#allocation2 + $0x78] sm:$0xff]  ;;  %v193_v36 = vld [vmem:[#allocation5 + $0x60] sm:$0xff]  ;;  %v194_v37 = vld [vmem:[#allocation5 + $0x68] sm:$0xff] }
  0x1a   :  { %138 = vmatpush.msra.mxu0 %v115_v23  ;;  %225 = vmatpush.msra.mxu2 %v199_v24  ;;  %v108_v38 = vld [vmem:[#allocation2 + $0x68] sm:$0xff]  ;;  %v107_v39 = vld [vmem:[#allocation2 + $0x60] sm:$0xff]  ;;  %v191_v40 = vld [vmem:[#allocation5 + $0x50] sm:$0xff] }
  0x1b   :  { %245 = vmatpush.msra.mxu3 %v200_v25  ;;  %159 = vmatpush.msra.mxu1 %v114_v26  ;;  %v192_v41 = vld [vmem:[#allocation5 + $0x58] sm:$0xff]  ;;  %v105_v43 = vld [vmem:[#allocation2 + $0x50] sm:$0xff]  ;;  %v189_v44 = vld [vmem:[#allocation5 + $0x40] sm:$0xff] }
  0x1c   :  { %139 = vmatpush.msra.mxu0 %v113_v27  ;;  %226 = vmatpush.msra.mxu2 %v197_v28  ;;  %v106_v42 = vld [vmem:[#allocation2 + $0x58] sm:$0xff]  ;;  %v190_v45 = vld [vmem:[#allocation5 + $0x48] sm:$0xff]  ;;  %v103_v47 = vld [vmem:[#allocation2 + $0x40] sm:$0xff] }
  0x1d   :  { %246 = vmatpush.msra.mxu3 %v198_v29  ;;  %160 = vmatpush.msra.mxu1 %v112_v30  ;;  %v104_v46 = vld [vmem:[#allocation2 + $0x48] sm:$0xff]  ;;  %v66_v48 = vld [vmem:[%s577_s1] sm:$0xf]  ;;  %v187_v49 = vld [vmem:[#allocation5 + $0x30] sm:$0xff] }
  0x1e   :  { %140 = vmatpush.msra.mxu0 %v111_v31  ;;  %227 = vmatpush.msra.mxu2 %v195_v32  ;;  %v188_v50 = vld [vmem:[#allocation5 + $0x38] sm:$0xff]  ;;  %75 = vst [vmem:[#allocation7 + $0x1] sm:$0xf] %v66_v48  ;;  %v101_v52 = vld [vmem:[#allocation2 + $0x30] sm:$0xff]  ;;  %v185_v53 = vld [vmem:[#allocation5 + $0x20] sm:$0xff] }
  0x1f   :  { %247 = vmatpush.msra.mxu3 %v196_v33  ;;  %161 = vmatpush.msra.mxu1 %v110_v34  ;;  %v102_v51 = vld [vmem:[#allocation2 + $0x38] sm:$0xff]  ;;  %76 = vst [vmem:[#allocation7 + $0x11] sm:$0xf] %v66_v48  ;;  %v186_v54 = vld [vmem:[#allocation5 + $0x28] sm:$0xff]  ;;  %v99_v56 = vld [vmem:[#allocation2 + $0x20] sm:$0xff] }
  0x20   :  { %141 = vmatpush.msra.mxu0 %v109_v35  ;;  %228 = vmatpush.msra.mxu2 %v193_v36  ;;  %77 = vst [vmem:[#allocation7 + $0x21] sm:$0xf] %v66_v48  ;;  %v100_v55 = vld [vmem:[#allocation2 + $0x28] sm:$0xff]  ;;  %v183_v57 = vld [vmem:[#allocation5 + $0x10] sm:$0xff]  ;;  %v184_v58 = vld [vmem:[#allocation5 + $0x18] sm:$0xff] }
  0x21   :  { %248 = vmatpush.msra.mxu3 %v194_v37  ;;  %162 = vmatpush.msra.mxu1 %v108_v38  ;;  %78 = vst [vmem:[#allocation7 + $0x31] sm:$0xf] %v66_v48  ;;  %v98_v59 = vld [vmem:[#allocation2 + $0x18] sm:$0xff]  ;;  %v97_v60 = vld [vmem:[#allocation2 + $0x10] sm:$0xff]  ;;  %v181_v61 = vld [vmem:[#allocation5] sm:$0xff] }
  0x22   :  { %142 = vmatpush.msra.mxu0 %v107_v39  ;;  %229 = vmatpush.msra.mxu2 %v191_v40  ;;  %v182_v62 = vld [vmem:[#allocation5 + $0x8] sm:$0xff]  ;;  %v180_v63 = vld [vmem:[%s579_s3] sm:$0xff]  ;;  %v81_v8 = vld [vmem:[%s578_s2 + $0x10] sm:$0xff]  ;;  %s455_s3 = smov 8  }
  0x23   :  { %249 = vmatpush.msra.mxu3 %v192_v41  ;;  %163 = vmatpush.msra.mxu1 %v106_v42  ;;  %v96_v0 = vld [vmem:[#allocation2 + $0x8] sm:$0xff]  ;;  %v95_v1 = vld [vmem:[#allocation2] sm:$0xff]  ;;  %v82_v9 = vld [vmem:[%s578_s2 + $0x18] sm:$0x7]  ;;  %89 = vst [vmem:[#allocation7 + $0x15] sm:$0xff] %v81_v8 }
  0x24   :  { %143 = vmatpush.msra.mxu0 %v105_v43  ;;  %230 = vmatpush.msra.mxu2 %v189_v44  ;;  %v67_v2 = vld [vmem:[%s576_s0] sm:$0x1]  ;;  %v68_v3 = vld [vmem:[%s576_s0 + $0x1] sm:$0x1]  ;;  %v69_v4 = vld [vmem:[%s576_s0 + $0x2] sm:$0x1] }
  0x25   :  { %250 = vmatpush.msra.mxu3 %v190_v45  ;;  %164 = vmatpush.msra.mxu1 %v104_v46  ;;  %v70_v5 = vld [vmem:[%s576_s0 + $0x3] sm:$0x1]  ;;  %71 = vst [vmem:[#allocation7] sm:$0x1] %v67_v2  ;;  %v80_v7 = vld [vmem:[%s578_s2 + $0x8] sm:$0x7] }
  0x26   :  { %144 = vmatpush.msra.mxu0 %v103_v47  ;;  %231 = vmatpush.msra.mxu2 %v187_v49  ;;  %72 = vst [vmem:[#allocation7 + $0x10] sm:$0x1] %v68_v3  ;;  %v79_v6 = vld [vmem:[%s578_s2] sm:$0xff]  ;;  %v84_v11 = vld [vmem:[%s578_s2 + $0x28] sm:$0x7]  ;;  %v85_v12 = vld [vmem:[%s578_s2 + $0x30] sm:$0xff] }
  0x27   :  { %251 = vmatpush.msra.mxu3 %v188_v50  ;;  %165 = vmatpush.msra.mxu1 %v102_v51  ;;  %73 = vst [vmem:[#allocation7 + $0x20] sm:$0x1] %v69_v4  ;;  %v83_v10 = vld [vmem:[%s578_s2 + $0x20] sm:$0xff]  ;;  %v86_v13 = vld [vmem:[%s578_s2 + $0x38] sm:$0x7]  ;;  %s456_s2 = smov [#allocation8]  }
  0x28   :  { %145 = vmatpush.msra.mxu0 %v101_v52  ;;  %232 = vmatpush.msra.mxu2 %v185_v53  ;;  %74 = vst [vmem:[#allocation7 + $0x30] sm:$0x1] %v70_v5  ;;  %v127_v14 = vld [vmem:[%s581_s5] sm:$0x3]  ;;  %s279_s14 = sshll.u32 %s456_s2, 4  ;;  %s457_s5 = smov [#allocation10]   ;;  %s280_s14 = int_to_ptr.vmem [resolvable:$true] %s279_s14 }
  0x29   :  { %252 = vmatpush.msra.mxu3 %v186_v54  ;;  %166 = vmatpush.msra.mxu1 %v100_v55  ;;  %87 = vst [vmem:[#allocation7 + $0x5] sm:$0xff] %v79_v6  ;;  %v130_v15 = vperm.slane %v127_v14, 1  ;;  %v129_v16 = vperm.slane %v127_v14, 0  ;;  %v213_v17 = vld [vmem:[%s583_s7] sm:$0x3]  ;;  %s290_s18 = sshll.u32 %s457_s5, 4  ;;  %s291_s18 = int_to_ptr.vmem [resolvable:$true] %s290_s18 }
  0x2a   :  { %146 = vmatpush.msra.mxu0 %v99_v56  ;;  %233 = vmatpush.msra.mxu2 %v183_v57  ;;  %88 = vst [vmem:[#allocation7 + $0xd] sm:$0x7] %v80_v7  ;;  %v215_v22 = vperm.slane %v213_v17, 0  ;;  %v216_v23 = vperm.slane %v213_v17, 1  ;;  %s292_s7 = sshll.u32 %s586_s10, 4  ;;  %s293_s7 = int_to_ptr.hbm [resolvable:$true] %s292_s7 }
  0x2b   :  { %253 = vmatpush.msra.mxu3 %v184_v58  ;;  %167 = vmatpush.msra.mxu1 %v98_v59  ;;  %90 = vst [vmem:[#allocation7 + $0x1d] sm:$0x7] %v82_v9 }
  0x2c   :  { %147 = vmatpush.msra.mxu0 %v97_v60  ;;  %234 = vmatpush.msra.mxu2 %v181_v61  ;;  %91 = vst [vmem:[#allocation7 + $0x25] sm:$0xff] %v83_v10 }
  0x2d   :  { %254 = vmatpush.msra.mxu3 %v182_v62  ;;  %235 = vmatmul.f32.vlgmr.msra.gmra.mxu2 %v180_v63  ;;  %92 = vst [vmem:[#allocation7 + $0x2d] sm:$0x7] %v84_v11 }
  0x2e   :  { %255 = vmatmul.f32.vlgmr.msra.gmra.mxu3 %v180_v63  ;;  %168 = vmatpush.msra.mxu1 %v96_v0  ;;  %93 = vst [vmem:[#allocation7 + $0x35] sm:$0xff] %v85_v12 }
  0x2f   :  { %148 = vmatpush.msra.mxu0 %v95_v1  ;;  %169 = vmatmul.f32.vlgmr.msra.gmra.mxu1 %v66_v48  ;;  %94 = vst [vmem:[#allocation7 + $0x3d] sm:$0x7] %v86_v13 }
  0x30   :  { %149 = vmatmul.f32.vlgmr.msra.gmra.mxu0 %v66_v48  ;;  %273 = dma.vmem_to_hbm [thread:$0]  %s266_s23, 1024, %s268_s6, [#allocation4], %s454_s8, %s454_s8, %s455_s3  }
  0xac   :  { %v170_v18 = vpop.f32.mrf.mxu1 }
  0xad   :  { %v150_v19 = vpop.f32.mrf.mxu0  ;;  %v171_v20 = vadd.f32 %v170_v18, %v130_v15 }
  0xae   :  { %v151_v21 = vadd.f32 %v150_v19, %v129_v16 }
  0xaf   :  { %v175_v24 = vrot.slane %v171_v20, 4 }
  0xb0   :  { %v236_v25 = vpop.f32.mrf.mxu2 }
  0xb1   :  { %v256_v26 = vpop.f32.mrf.mxu3  ;;  %v237_v27 = vadd.f32 %v236_v25, %v215_v22  ;;  %v177_v29 = vsel %vm176_vm0, %v151_v21, %v175_v24 }
  0xb2   :  { %v257_v28 = vadd.f32 %v256_v26, %v216_v23  ;;  %179 = vst [vmem:[#allocation8] sm:$0xff] %v177_v29 }
  0xb3   :  { %259 = vst [vmem:[#allocation10] sm:$0xff] %v237_v27  ;;  %284 = dma.vmem_to_hbm [thread:$0]  %s280_s14, 128, %s282_s17, [#allocation9]  }
  0xb4   :  { %260 = vst [vmem:[#allocation10 + $0x8] sm:$0xff] %v257_v28 }
  0xb5   :  { %295 = dma.vmem_to_hbm [thread:$0]  %s291_s18, 256, %s293_s7, [#allocation9]  }
  0xb6   :  { %445 = dma.done.wait [#allocation4], 1024  }
  0xb7   :  { %446 = vsyncadd [#allocation4], 4294966272 }
  0xb8   :  { %447 = dma.done.wait [#allocation9], 384  }
  0xb9   :  { %448 = vsyncadd [#allocation9], 4294966912 }
  0xba   :  { %308 = vsyncpa [#allocation3], 1 }
  0xbb   :  { %309 = vsyncpa [#allocation6], 1 }
  0xbc   :  { %310 = vsyncpa [#allocation4], 1 }
  0xbd   :  { %311 = vsyncpa [#allocation9], 1 }

</bundles_post_ra>
